<compile_context>
chip_gen: v7x
topology: tpu7x:2x2x1
jax: 0.10.0
libtpu: 0.0.40
codegen_flags: <defaults>
</compile_context>

<pallas_src>
import jax
import jax.numpy as jnp
from jax.experimental import pallas as pl
from jax.experimental.pallas import tpu as pltpu

_LANES = 1024                        # last-dim tile: multiple of 128 -> unmasked vst
_TARGET_BLOCK_BYTES = 2 * 1024 * 1024  # ~2 MiB/buffer: v7x/v5e-safe VMEM ceiling
_MIN_PALLAS_BYTES = 256 * 1024       # below this the custom-call launch dominates
_MIN_GRID = 4                        # >=2 for DMA overlap; 4 balances v7x's 2 TCs


def _add_one_kernel(x_ref, o_ref):
    # Scalar immediate broadcast folds into the VPU add; dtype-preserving.
    o_ref[...] = x_ref[...] + 1


def _round_up(x, m):
    return (x + m - 1) // m * m


def hello_world_nn(x, *, donate=False):
    """Pallas equivalent of Hello_World_NN.forward: returns input + 1.

    Accepts a 0-d scalar or any-shaped array; preserves shape and dtype.
    """
    x = jnp.asarray(x)  # preserve incoming dtype
    orig_shape = x.shape
    n = x.size
    itemsize = jnp.dtype(x.dtype).itemsize
    nbytes = n * itemsize

    # XLA path: tiny / scalar inputs (launch-bound) and ragged sizes whose
    # Pallas handling would need a pad+slice round trip (3x HBM traffic).
    if nbytes < _MIN_PALLAS_BYTES or n % _LANES != 0:
        return x + 1

    rows = n // _LANES
    x2d = x.reshape(rows, _LANES)  # pure view: n is a multiple of _LANES

    # dtype-aware tiling: ~2 MiB per buffer, block rows a multiple of the
    # sublane-packing granularity (8 for 4B, 16 for 2B, 32 for 1B dtypes).
    sublane = max(8, 32 // itemsize)
    max_block_rows = max(sublane, _TARGET_BLOCK_BYTES // (_LANES * itemsize))
    block_rows = int(min(
        max_block_rows,
        max(sublane, _round_up(pl.cdiv(rows, _MIN_GRID), sublane))))
    grid = int(pl.cdiv(rows, block_rows))  # uneven final block: OOB writes masked

    out = pl.pallas_call(
        _add_one_kernel,
        out_shape=jax.ShapeDtypeStruct(x2d.shape, x2d.dtype),
        grid=(grid,),
        in_specs=[pl.BlockSpec((block_rows, _LANES), lambda i: (i, 0))],
        out_specs=pl.BlockSpec((block_rows, _LANES), lambda i: (i, 0)),
        input_output_aliases={0: 0} if donate else {},
        compiler_params=pltpu.CompilerParams(
            dimension_semantics=("parallel",)),
    )(x2d)

    return out.reshape(orig_shape)


if __name__ == "__main__":
    key = jax.random.PRNGKey(0)
    k1, k2, k3 = jax.random.split(key, 3)

    # 1) The module's actual usage: 0-d scalar (XLA fast path).
    x_scalar = jnp.asarray(1.0, dtype=jnp.float32)
    y_scalar = jax.block_until_ready(hello_world_nn(x_scalar))
    assert y_scalar.shape == x_scalar.shape and y_scalar.dtype == x_scalar.dtype
    assert jnp.allclose(y_scalar, x_scalar + 1.0)

    # 2) Small tensor (2,4,16,16) = 8 KiB: below threshold -> XLA path.
    x_small = jax.random.normal(k1, (2, 4, 16, 16), dtype=jnp.float32)
    y_small = jax.block_until_ready(hello_world_nn(x_small))
    assert y_small.shape == x_small.shape and y_small.dtype == x_small.dtype
    assert jnp.allclose(y_small, x_small + 1.0)

    # 3) Pallas path, f32, rows (330) not a multiple of block_rows (88):
    #    grid=4 with a masked final block -- no pad, no slice.
    x_f32 = jax.random.normal(k2, (330, 32, 32), dtype=jnp.float32)
    y_f32 = jax.block_until_ready(hello_world_nn(x_f32))
    assert y_f32.shape == x_f32.shape and y_f32.dtype == x_f32.dtype
    assert jnp.allclose(y_f32, x_f32 + 1.0)

    # 4) Pallas path, bf16 dtype-aware blocks (128 rows x 1024 lanes, grid=4).
    x_bf16 = jax.random.normal(k3, (512, 1024), dtype=jnp.bfloat16)
    y_bf16 = jax.block_until_ready(hello_world_nn(x_bf16))
    assert y_bf16.shape == x_bf16.shape and y_bf16.dtype == x_bf16.dtype
    assert jnp.allclose(y_bf16.astype(jnp.float32),
                        x_bf16.astype(jnp.float32) + 1.0, atol=5e-2)

    print("KERNEL_OK")
</pallas_src>

<mosaic_0001>
module attributes {stable_mosaic.version = 11 : i64} {
  func.func @_add_one_kernel(%arg0: i32, %arg1: memref<88x1024xf32, #tpu.memory_space<vmem>>, %arg2: memref<88x1024xf32, #tpu.memory_space<vmem>>) attributes {dimension_semantics = [#tpu.dimension_semantics<parallel>], iteration_bounds = array<i64: 4>, scalar_prefetch = 0 : i64, scratch_operands = 0 : i64, tpu.core_type = #tpu.core_type<tc>, window_params = [{transform_indices = @transform_0, window_bounds = array<i64: 88, 1024>}, {transform_indices = @transform_1, window_bounds = array<i64: 88, 1024>}]} {
    %c0 = arith.constant 0 : index
    %c0_0 = arith.constant 0 : index
    %0 = vector.load %arg1[%c0, %c0_0] : memref<88x1024xf32, #tpu.memory_space<vmem>>, vector<88x1024xf32>
    %cst = arith.constant 1.000000e+00 : f32
    %1 = vector.broadcast %cst : f32 to vector<88x1024xf32>
    %2 = arith.addf %0, %1 : vector<88x1024xf32>
    %c0_1 = arith.constant 0 : index
    %c0_2 = arith.constant 0 : index
    %3 = vector.load %arg2[%c0_1, %c0_2] : memref<88x1024xf32, #tpu.memory_space<vmem>>, vector<88x1024xf32>
    tpu.vector_store %arg2[%c0_1, %c0_2], %2 {strides = array<i32>} : memref<88x1024xf32, #tpu.memory_space<vmem>>, vector<88x1024xf32>,
    return
  }
  func.func @transform_0(%arg0: i32) -> (i32, i32) {
    %c0_i32 = arith.constant 0 : i32
    %c0_i32_0 = arith.constant 0 : i32
    return %arg0, %c0_i32 : i32, i32
  }
  func.func @transform_1(%arg0: i32) -> (i32, i32) {
    %c0_i32 = arith.constant 0 : i32
    %c0_i32_0 = arith.constant 0 : i32
    return %arg0, %c0_i32 : i32, i32
  }
}

</mosaic_0001>

<bundles_post_ra>
// kernel: tpu_custom_call.1
= control target key start
LH: loop header
LB: loop body
LE: loop exit
PB: predicated region body
PF: predicated region fallthrough
CT: control target
= control target key end

     0   :  { %6 = vsyncpa [#allocation3], 0  ;;  %s1047_s0 = inlined_call_operand.hbm [shape: f32[330,1024], index: 0, kind: input, shape index: {}]   ;;  %s1048_s1 = inlined_call_operand.hbm [shape: f32[330,1024], index: 1, kind: output, shape index: {}]  }
   0x1   :  { %8 = vsyncpa [#allocation3 + $0x1], 0 }
   0x2   :  { %9 = vsyncpa [#allocation4], 0 }
   0x3   :  { %11 = vsyncpa [#allocation4 + $0x1], 0  ;;  %s699_s6 = smov 0   ;;  %s701_s7 = smov 0  }
   0x4   :  { %s703_s8 = smov 0   ;;  %s705_s9 = smov 0  }
   0x5 LB: > { %s720_s10 = sadd.s32 4294967295, %s681_s9   ;;  %s514_s11 = sadd.s32 4294967294, %s681_s9   ;;  %s681_s9 = sphi %s705_s9, %s1056_s9   ;;  %s677_s8 = sphi %s703_s8, %s1055_s8   ;;  %s673_s7 = sphi %s701_s7, %s1054_s7   ;;  %s669_s6 = sphi %s699_s6, %s1053_s6  }
   0x6   : > { %s724_s12 = sadd.s32 1, %s681_s9   ;;  %s24_s13 = sadd.s32 1, %s677_s8 }
   0x7   : > { %s21_s14 = ssub.s32 %s681_s9, %s724_s12  ;;  %p31_p0 = scmp.ne.s32.totalorder %s677_s8, %s673_s7 }
   0x8   : > { %p22_p1 = scmp.eq.s32.totalorder %s21_s14, 0  ;;  %p32_p2 = scmp.eq.s32.totalorder %s681_s9, 0 }
   0x9   : > { %p37_p3 = scmp.ne.s32.totalorder %s673_s7, %s669_s6  ;;  %p38_p4 = scmp.eq.s32.totalorder %s720_s10, 0 }
   0xa   : > { %s736_s15 = scalar_select %p22_p1, %s677_s8, %s24_s13  }
   0xb   : > { %p33_p5 = por %p32_p2, %p31_p0  ;;  %p738_p6 = por %p38_p4, %p37_p3 }
   0xc   : > { %p61_p7 = scmp.eq.s32.totalorder %s720_s10, 3  ;;  %p67_p8 = scmp.eq.s32.totalorder %s514_s11, 3 }
   0xd   : > { %p516_p11 = scmp.ge.s32.totalorder %s681_s9, 4 }
   0xe   : > { %p743_p9 = por %p61_p7, %p31_p0  ;;  %p747_p10 = por %p67_p8, %p37_p3 }
   0xf   : > { %83 = sbr.rel (%p516_p11) target bundleno = 57 (0x39), region = 16 }
  0x10   : > { %s1051_s18 = scalar_select %p747_p10, 1, 0 }
  0x16   : > { %86 = sbr.rel (!%p33_p5) target bundleno = 57 (0x39), region = 20  ;;  %s87_s19 = sand.u32 (%p33_p5), 1, %s677_s8  }
  0x17   : > { %s92_s20 = smul.u32 (%p33_p5), 11, %s681_s9  ;;  %s757_s25 = scalar_lea.sflag (%p33_p5), [#allocation3], %s87_s19 }
  0x18   : > { %s542_s21 = smul.u32 (%p33_p5), 704, %s87_s19 }
  0x19   : > { %s93_s22 = ssub.s32 (%p33_p5), 42, %s92_s20 }
  0x1a   : > { %p94_p12 = scmp.lt.s32.totalorder (%p33_p5), %s93_s22, 11  ;;  %s91_s26 = scalar_lea.vmem (%p33_p5), [#allocation2], %s542_s21 }
  0x1d   : > { %s1058_s22 = smov (!%p94_p12, %s93_s22), 11 }
  0x1e   : > { %s754_s23 = sshll.u32 %s1058_s22, 10 }
  0x1f   : > { %s99_s24 = ssub.s32 11264, %s754_s23 }
  0x20   : > { %100 = vsyncadd %s757_s25, %s99_s24  ;;  %p519_p13 = scmp.ne.s32.totalorder %s754_s23, 0  ;;  %s540_s27 = smul.u32 11264, %s681_s9 }
  0x21   : > { %s106_s28 = sshll.u32 %s91_s26, 4  ;;  %s591_s11 = scalar_lea.hbm %s1047_s0, 43008  ;;  %s767_s28 = int_to_ptr.vmem [resolvable:$true] %s106_s28 }
  0x22   : > { %s765_s2 = scalar_lea.hbm %s1047_s0, %s540_s27 }
  0x23   : > { %s587_s3 = scalar_lea.hbm %s765_s2, %s754_s23  ;;  %p592_p3 = scmp.lt.u32.totalorder %s765_s2, %s1047_s0 }
  0x24   : > { %p588_p0 = scmp.ne.s32.totalorder %s765_s2, %s587_s3  ;;  %p593_p4 = scmp.lt.u32.totalorder %s591_s11, %s587_s3 }
  0x25   : > { %p595_p7 = scmp.lt.u32.totalorder %s587_s3, %s765_s2 }
  0x26   : > { %p589_p1 = pnand %p588_p0, %p519_p13  ;;  %p594_p5 = por %p593_p4, %p592_p3 }
  0x28   : > { %p590_p2 = pneg %p589_p1  ;;  %p596_p8 = por %p595_p7, %p594_p5 }
  0x2a   : > { %p597_p11 = pnand %p596_p8, %p590_p2 }
  0x2c   : > { %600 = shalt.err (!%p597_p11)
}
  0x2d   : > { %s601_s19 = scalar_lea.vmem %s767_s28, %s754_s23  ;;  %s683_s20 = smov [#allocation2]  }
  0x2e   : > { %p602_p12 = scmp.ne.s32.totalorder %s767_s28, %s601_s19  ;;  %s605_s21 = sshll.u32 %s683_s20, 4  ;;  %s606_s21 = int_to_ptr.vmem [resolvable:$false] %s605_s21 }
  0x2f   : > { %s607_s22 = scalar_lea.vmem %s606_s21, 22528  ;;  %p608_p10 = scmp.lt.s32.totalorder %s767_s28, %s606_s21 }
  0x30   : > { %p603_p0 = pnand %p602_p12, %p519_p13  ;;  %p609_p3 = scmp.lt.s32.totalorder %s607_s22, %s601_s19 }
  0x32   : > { %p604_p1 = pneg %p603_p0  ;;  %p610_p4 = por %p609_p3, %p608_p10 }
  0x34   : > { %p611_p5 = pnand %p610_p4, %p604_p1 }
  0x36   : > { %614 = shalt.err (!%p611_p5)
}
  0x37   : > { %s684_s24 = smov 1024   ;;  %s685_s26 = smov 64  }
  0x38   : > { %112 = dma.hbm_to_vmem [thread:$0]  (%p519_p13), %s765_s2, %s754_s23, %s767_s28, %s757_s25, %s684_s24, %s684_s24, %s685_s26  }
  0x39 PF: > { %p524_p2 = scmp.ge.s32.totalorder %s681_s9, 1  ;;  %p114_p7 = scmp.lt.s32.totalorder %s681_s9, 5 }
  0x3b   : > { %p115_p8 = pnand %p524_p2, %p114_p7 }
  0x3c   : > { %s797_s27 = sand.u32 (!%p115_p8), 1, %s673_s7  }
  0x3d   : > { %118 = sbr.rel (%p115_p8) target bundleno = 147 (0x93), region = 24  ;;  %s121_s30 = scalar_lea.sflag (!%p115_p8), [#allocation3], %s797_s27 }
  0x3e   : > { %s543_s29 = smul.u32 (!%p115_p8), 704, %s797_s27 }
  0x40   : > { %s801_s3 = scalar_lea.vmem (!%p115_p8), [#allocation2], %s543_s29 }
  0x44   : > { %660 = dma.done.wait (%p738_p6), %s121_s30, 11264  }
  0x45   : > { %662 = vsyncadd (%p738_p6), %s121_s30, 4294956032  ;;  %v155_v0 = vld [vmem:[%s801_s3] sm:$0xff]  ;;  %v156_v1 = vld [vmem:[%s801_s3 + $0x8] sm:$0xff]  ;;  %s816_s16 = scalar_lea.vmem [#allocation5], %s543_s29  ;;  %s420_s23 = scalar_lea.sflag [#allocation4], %s797_s27 }
  0x46   : > { %v157_v2 = vld [vmem:[%s801_s3 + $0x10] sm:$0xff]  ;;  %v243_v3 = vadd.f32 1.0, %v155_v0  ;;  %v244_v4 = vadd.f32 1.0, %v156_v1  ;;  %v158_v6 = vld [vmem:[%s801_s3 + $0x18] sm:$0xff]  ;;  %v159_v7 = vld [vmem:[%s801_s3 + $0x20] sm:$0xff]  ;;  %s427_s25 = smul.u32 (%p743_p9), 11, %s720_s10 }
  0x47   : > { %v245_v5 = vadd.f32 1.0, %v157_v2  ;;  %v160_v8 = vld [vmem:[%s801_s3 + $0x28] sm:$0xff]  ;;  %v246_v9 = vadd.f32 1.0, %v158_v6  ;;  %v247_v10 = vadd.f32 1.0, %v159_v7  ;;  %v161_v12 = vld [vmem:[%s801_s3 + $0x30] sm:$0xff]  ;;  %v162_v13 = vld [vmem:[%s801_s3 + $0x38] sm:$0xff] }
  0x48   : > { %v248_v11 = vadd.f32 1.0, %v160_v8  ;;  %v163_v14 = vld [vmem:[%s801_s3 + $0x40] sm:$0xff]  ;;  %331 = vst [vmem:[%s816_s16] sm:$0xff] %v243_v3  ;;  %332 = vst [vmem:[%s816_s16 + $0x8] sm:$0xff] %v244_v4  ;;  %v249_v15 = vadd.f32 1.0, %v161_v12  ;;  %v250_v16 = vadd.f32 1.0, %v162_v13  ;;  %v164_v18 = vld [vmem:[%s801_s3 + $0x48] sm:$0xff] }
  0x49   : > { %333 = vst [vmem:[%s816_s16 + $0x10] sm:$0xff] %v245_v5  ;;  %v251_v17 = vadd.f32 1.0, %v163_v14  ;;  %v165_v19 = vld [vmem:[%s801_s3 + $0x50] sm:$0xff]  ;;  %v166_v20 = vld [vmem:[%s801_s3 + $0x58] sm:$0xff]  ;;  %334 = vst [vmem:[%s816_s16 + $0x18] sm:$0xff] %v246_v9  ;;  %v252_v21 = vadd.f32 1.0, %v164_v18 }
  0x4a   : > { %335 = vst [vmem:[%s816_s16 + $0x20] sm:$0xff] %v247_v10  ;;  %336 = vst [vmem:[%s816_s16 + $0x28] sm:$0xff] %v248_v11  ;;  %v253_v22 = vadd.f32 1.0, %v165_v19  ;;  %v254_v23 = vadd.f32 1.0, %v166_v20  ;;  %v167_v24 = vld [vmem:[%s801_s3 + $0x60] sm:$0xff]  ;;  %v168_v25 = vld [vmem:[%s801_s3 + $0x68] sm:$0xff] }
  0x4b   : > { %v169_v26 = vld [vmem:[%s801_s3 + $0x70] sm:$0xff]  ;;  %337 = vst [vmem:[%s816_s16 + $0x30] sm:$0xff] %v249_v15  ;;  %338 = vst [vmem:[%s816_s16 + $0x38] sm:$0xff] %v250_v16  ;;  %v255_v27 = vadd.f32 1.0, %v167_v24  ;;  %v256_v28 = vadd.f32 1.0, %v168_v25  ;;  %v170_v30 = vld [vmem:[%s801_s3 + $0x78] sm:$0xff] }
  0x4c   : > { %339 = vst [vmem:[%s816_s16 + $0x40] sm:$0xff] %v251_v17  ;;  %v257_v29 = vadd.f32 1.0, %v169_v26  ;;  %v171_v31 = vld [vmem:[%s801_s3 + $0x80] sm:$0xff]  ;;  %v172_v32 = vld [vmem:[%s801_s3 + $0x88] sm:$0xff]  ;;  %340 = vst [vmem:[%s816_s16 + $0x48] sm:$0xff] %v252_v21  ;;  %v258_v33 = vadd.f32 1.0, %v170_v30 }
  0x4d   : > { %341 = vst [vmem:[%s816_s16 + $0x50] sm:$0xff] %v253_v22  ;;  %342 = vst [vmem:[%s816_s16 + $0x58] sm:$0xff] %v254_v23  ;;  %v259_v34 = vadd.f32 1.0, %v171_v31  ;;  %v260_v35 = vadd.f32 1.0, %v172_v32  ;;  %v173_v36 = vld [vmem:[%s801_s3 + $0x90] sm:$0xff]  ;;  %v174_v37 = vld [vmem:[%s801_s3 + $0x98] sm:$0xff] }
  0x4e   : > { %v175_v38 = vld [vmem:[%s801_s3 + $0xa0] sm:$0xff]  ;;  %343 = vst [vmem:[%s816_s16 + $0x60] sm:$0xff] %v255_v27  ;;  %344 = vst [vmem:[%s816_s16 + $0x68] sm:$0xff] %v256_v28  ;;  %v261_v39 = vadd.f32 1.0, %v173_v36  ;;  %v262_v40 = vadd.f32 1.0, %v174_v37  ;;  %v176_v42 = vld [vmem:[%s801_s3 + $0xa8] sm:$0xff] }
  0x4f   : > { %345 = vst [vmem:[%s816_s16 + $0x70] sm:$0xff] %v257_v29  ;;  %v263_v41 = vadd.f32 1.0, %v175_v38  ;;  %v177_v43 = vld [vmem:[%s801_s3 + $0xb0] sm:$0xff]  ;;  %v178_v44 = vld [vmem:[%s801_s3 + $0xb8] sm:$0xff]  ;;  %346 = vst [vmem:[%s816_s16 + $0x78] sm:$0xff] %v258_v33  ;;  %v264_v45 = vadd.f32 1.0, %v176_v42 }
  0x50   : > { %347 = vst [vmem:[%s816_s16 + $0x80] sm:$0xff] %v259_v34  ;;  %348 = vst [vmem:[%s816_s16 + $0x88] sm:$0xff] %v260_v35  ;;  %v265_v46 = vadd.f32 1.0, %v177_v43  ;;  %v266_v47 = vadd.f32 1.0, %v178_v44  ;;  %v179_v48 = vld [vmem:[%s801_s3 + $0xc0] sm:$0xff]  ;;  %v180_v49 = vld [vmem:[%s801_s3 + $0xc8] sm:$0xff] }
  0x51   : > { %v181_v50 = vld [vmem:[%s801_s3 + $0xd0] sm:$0xff]  ;;  %349 = vst [vmem:[%s816_s16 + $0x90] sm:$0xff] %v261_v39  ;;  %350 = vst [vmem:[%s816_s16 + $0x98] sm:$0xff] %v262_v40  ;;  %v267_v51 = vadd.f32 1.0, %v179_v48  ;;  %v268_v52 = vadd.f32 1.0, %v180_v49  ;;  %v182_v54 = vld [vmem:[%s801_s3 + $0xd8] sm:$0xff] }
  0x52   : > { %351 = vst [vmem:[%s816_s16 + $0xa0] sm:$0xff] %v263_v41  ;;  %v269_v53 = vadd.f32 1.0, %v181_v50  ;;  %v183_v55 = vld [vmem:[%s801_s3 + $0xe0] sm:$0xff]  ;;  %v184_v56 = vld [vmem:[%s801_s3 + $0xe8] sm:$0xff]  ;;  %352 = vst [vmem:[%s816_s16 + $0xa8] sm:$0xff] %v264_v45  ;;  %v270_v57 = vadd.f32 1.0, %v182_v54 }
  0x53   : > { %353 = vst [vmem:[%s816_s16 + $0xb0] sm:$0xff] %v265_v46  ;;  %354 = vst [vmem:[%s816_s16 + $0xb8] sm:$0xff] %v266_v47  ;;  %v271_v58 = vadd.f32 1.0, %v183_v55  ;;  %v272_v59 = vadd.f32 1.0, %v184_v56  ;;  %v185_v60 = vld [vmem:[%s801_s3 + $0xf0] sm:$0xff]  ;;  %v186_v61 = vld [vmem:[%s801_s3 + $0xf8] sm:$0xff] }
  0x54   : > { %v187_v62 = vld [vmem:[%s801_s3 + $0x100] sm:$0xff]  ;;  %355 = vst [vmem:[%s816_s16 + $0xc0] sm:$0xff] %v267_v51  ;;  %356 = vst [vmem:[%s816_s16 + $0xc8] sm:$0xff] %v268_v52  ;;  %v273_v63 = vadd.f32 1.0, %v185_v60  ;;  %v274_v0 = vadd.f32 1.0, %v186_v61  ;;  %v188_v2 = vld [vmem:[%s801_s3 + $0x108] sm:$0xff] }
  0x55   : > { %357 = vst [vmem:[%s816_s16 + $0xd0] sm:$0xff] %v269_v53  ;;  %v275_v1 = vadd.f32 1.0, %v187_v62  ;;  %v189_v3 = vld [vmem:[%s801_s3 + $0x110] sm:$0xff]  ;;  %v190_v4 = vld [vmem:[%s801_s3 + $0x118] sm:$0xff]  ;;  %358 = vst [vmem:[%s816_s16 + $0xd8] sm:$0xff] %v270_v57  ;;  %v276_v5 = vadd.f32 1.0, %v188_v2 }
  0x56   : > { %359 = vst [vmem:[%s816_s16 + $0xe0] sm:$0xff] %v271_v58  ;;  %360 = vst [vmem:[%s816_s16 + $0xe8] sm:$0xff] %v272_v59  ;;  %v277_v6 = vadd.f32 1.0, %v189_v3  ;;  %v278_v7 = vadd.f32 1.0, %v190_v4  ;;  %v191_v8 = vld [vmem:[%s801_s3 + $0x120] sm:$0xff]  ;;  %v192_v9 = vld [vmem:[%s801_s3 + $0x128] sm:$0xff] }
  0x57   : > { %v193_v10 = vld [vmem:[%s801_s3 + $0x130] sm:$0xff]  ;;  %361 = vst [vmem:[%s816_s16 + $0xf0] sm:$0xff] %v273_v63  ;;  %362 = vst [vmem:[%s816_s16 + $0xf8] sm:$0xff] %v274_v0  ;;  %v279_v11 = vadd.f32 1.0, %v191_v8  ;;  %v280_v12 = vadd.f32 1.0, %v192_v9  ;;  %v194_v14 = vld [vmem:[%s801_s3 + $0x138] sm:$0xff] }
  0x58   : > { %363 = vst [vmem:[%s816_s16 + $0x100] sm:$0xff] %v275_v1  ;;  %v281_v13 = vadd.f32 1.0, %v193_v10  ;;  %v195_v15 = vld [vmem:[%s801_s3 + $0x140] sm:$0xff]  ;;  %v196_v16 = vld [vmem:[%s801_s3 + $0x148] sm:$0xff]  ;;  %364 = vst [vmem:[%s816_s16 + $0x108] sm:$0xff] %v276_v5  ;;  %v282_v17 = vadd.f32 1.0, %v194_v14 }
  0x59   : > { %365 = vst [vmem:[%s816_s16 + $0x110] sm:$0xff] %v277_v6  ;;  %366 = vst [vmem:[%s816_s16 + $0x118] sm:$0xff] %v278_v7  ;;  %v283_v18 = vadd.f32 1.0, %v195_v15  ;;  %v284_v19 = vadd.f32 1.0, %v196_v16  ;;  %v197_v20 = vld [vmem:[%s801_s3 + $0x150] sm:$0xff]  ;;  %v198_v21 = vld [vmem:[%s801_s3 + $0x158] sm:$0xff] }
  0x5a   : > { %v199_v22 = vld [vmem:[%s801_s3 + $0x160] sm:$0xff]  ;;  %367 = vst [vmem:[%s816_s16 + $0x120] sm:$0xff] %v279_v11  ;;  %368 = vst [vmem:[%s816_s16 + $0x128] sm:$0xff] %v280_v12  ;;  %v285_v23 = vadd.f32 1.0, %v197_v20  ;;  %v286_v24 = vadd.f32 1.0, %v198_v21  ;;  %v200_v26 = vld [vmem:[%s801_s3 + $0x168] sm:$0xff] }
  0x5b   : > { %369 = vst [vmem:[%s816_s16 + $0x130] sm:$0xff] %v281_v13  ;;  %v287_v25 = vadd.f32 1.0, %v199_v22  ;;  %v201_v27 = vld [vmem:[%s801_s3 + $0x170] sm:$0xff]  ;;  %v202_v28 = vld [vmem:[%s801_s3 + $0x178] sm:$0xff]  ;;  %370 = vst [vmem:[%s816_s16 + $0x138] sm:$0xff] %v282_v17  ;;  %v288_v29 = vadd.f32 1.0, %v200_v26 }
  0x5c   : > { %371 = vst [vmem:[%s816_s16 + $0x140] sm:$0xff] %v283_v18  ;;  %372 = vst [vmem:[%s816_s16 + $0x148] sm:$0xff] %v284_v19  ;;  %v289_v30 = vadd.f32 1.0, %v201_v27  ;;  %v290_v31 = vadd.f32 1.0, %v202_v28  ;;  %v203_v32 = vld [vmem:[%s801_s3 + $0x180] sm:$0xff]  ;;  %v204_v33 = vld [vmem:[%s801_s3 + $0x188] sm:$0xff] }
  0x5d   : > { %v205_v34 = vld [vmem:[%s801_s3 + $0x190] sm:$0xff]  ;;  %373 = vst [vmem:[%s816_s16 + $0x150] sm:$0xff] %v285_v23  ;;  %374 = vst [vmem:[%s816_s16 + $0x158] sm:$0xff] %v286_v24  ;;  %v291_v35 = vadd.f32 1.0, %v203_v32  ;;  %v292_v36 = vadd.f32 1.0, %v204_v33  ;;  %v206_v38 = vld [vmem:[%s801_s3 + $0x198] sm:$0xff] }
  0x5e   : > { %375 = vst [vmem:[%s816_s16 + $0x160] sm:$0xff] %v287_v25  ;;  %v293_v37 = vadd.f32 1.0, %v205_v34  ;;  %v207_v39 = vld [vmem:[%s801_s3 + $0x1a0] sm:$0xff]  ;;  %v208_v40 = vld [vmem:[%s801_s3 + $0x1a8] sm:$0xff]  ;;  %376 = vst [vmem:[%s816_s16 + $0x168] sm:$0xff] %v288_v29  ;;  %v294_v41 = vadd.f32 1.0, %v206_v38 }
  0x5f   : > { %377 = vst [vmem:[%s816_s16 + $0x170] sm:$0xff] %v289_v30  ;;  %378 = vst [vmem:[%s816_s16 + $0x178] sm:$0xff] %v290_v31  ;;  %v295_v42 = vadd.f32 1.0, %v207_v39  ;;  %v296_v43 = vadd.f32 1.0, %v208_v40  ;;  %v209_v44 = vld [vmem:[%s801_s3 + $0x1b0] sm:$0xff]  ;;  %v210_v45 = vld [vmem:[%s801_s3 + $0x1b8] sm:$0xff] }
  0x60   : > { %v211_v46 = vld [vmem:[%s801_s3 + $0x1c0] sm:$0xff]  ;;  %379 = vst [vmem:[%s816_s16 + $0x180] sm:$0xff] %v291_v35  ;;  %380 = vst [vmem:[%s816_s16 + $0x188] sm:$0xff] %v292_v36  ;;  %v297_v47 = vadd.f32 1.0, %v209_v44  ;;  %v298_v48 = vadd.f32 1.0, %v210_v45  ;;  %v212_v50 = vld [vmem:[%s801_s3 + $0x1c8] sm:$0xff] }
  0x61   : > { %381 = vst [vmem:[%s816_s16 + $0x190] sm:$0xff] %v293_v37  ;;  %v299_v49 = vadd.f32 1.0, %v211_v46  ;;  %v213_v51 = vld [vmem:[%s801_s3 + $0x1d0] sm:$0xff]  ;;  %v214_v52 = vld [vmem:[%s801_s3 + $0x1d8] sm:$0xff]  ;;  %382 = vst [vmem:[%s816_s16 + $0x198] sm:$0xff] %v294_v41  ;;  %v300_v53 = vadd.f32 1.0, %v212_v50 }
  0x62   : > { %383 = vst [vmem:[%s816_s16 + $0x1a0] sm:$0xff] %v295_v42  ;;  %384 = vst [vmem:[%s816_s16 + $0x1a8] sm:$0xff] %v296_v43  ;;  %v301_v54 = vadd.f32 1.0, %v213_v51  ;;  %v302_v55 = vadd.f32 1.0, %v214_v52  ;;  %v215_v56 = vld [vmem:[%s801_s3 + $0x1e0] sm:$0xff]  ;;  %v216_v57 = vld [vmem:[%s801_s3 + $0x1e8] sm:$0xff] }
  0x63   : > { %v217_v58 = vld [vmem:[%s801_s3 + $0x1f0] sm:$0xff]  ;;  %385 = vst [vmem:[%s816_s16 + $0x1b0] sm:$0xff] %v297_v47  ;;  %386 = vst [vmem:[%s816_s16 + $0x1b8] sm:$0xff] %v298_v48  ;;  %v303_v59 = vadd.f32 1.0, %v215_v56  ;;  %v304_v60 = vadd.f32 1.0, %v216_v57  ;;  %v218_v62 = vld [vmem:[%s801_s3 + $0x1f8] sm:$0xff] }
  0x64   : > { %387 = vst [vmem:[%s816_s16 + $0x1c0] sm:$0xff] %v299_v49  ;;  %v305_v61 = vadd.f32 1.0, %v217_v58  ;;  %v219_v63 = vld [vmem:[%s801_s3 + $0x200] sm:$0xff]  ;;  %v220_v0 = vld [vmem:[%s801_s3 + $0x208] sm:$0xff]  ;;  %388 = vst [vmem:[%s816_s16 + $0x1c8] sm:$0xff] %v300_v53  ;;  %v306_v1 = vadd.f32 1.0, %v218_v62 }
  0x65   : > { %389 = vst [vmem:[%s816_s16 + $0x1d0] sm:$0xff] %v301_v54  ;;  %390 = vst [vmem:[%s816_s16 + $0x1d8] sm:$0xff] %v302_v55  ;;  %v307_v2 = vadd.f32 1.0, %v219_v63  ;;  %v308_v3 = vadd.f32 1.0, %v220_v0  ;;  %v221_v4 = vld [vmem:[%s801_s3 + $0x210] sm:$0xff]  ;;  %v222_v5 = vld [vmem:[%s801_s3 + $0x218] sm:$0xff] }
  0x66   : > { %v223_v6 = vld [vmem:[%s801_s3 + $0x220] sm:$0xff]  ;;  %391 = vst [vmem:[%s816_s16 + $0x1e0] sm:$0xff] %v303_v59  ;;  %392 = vst [vmem:[%s816_s16 + $0x1e8] sm:$0xff] %v304_v60  ;;  %v309_v7 = vadd.f32 1.0, %v221_v4  ;;  %v310_v8 = vadd.f32 1.0, %v222_v5  ;;  %v224_v10 = vld [vmem:[%s801_s3 + $0x228] sm:$0xff] }
  0x67   : > { %393 = vst [vmem:[%s816_s16 + $0x1f0] sm:$0xff] %v305_v61  ;;  %v311_v9 = vadd.f32 1.0, %v223_v6  ;;  %v225_v11 = vld [vmem:[%s801_s3 + $0x230] sm:$0xff]  ;;  %v226_v12 = vld [vmem:[%s801_s3 + $0x238] sm:$0xff]  ;;  %394 = vst [vmem:[%s816_s16 + $0x1f8] sm:$0xff] %v306_v1  ;;  %v312_v13 = vadd.f32 1.0, %v224_v10 }
  0x68   : > { %395 = vst [vmem:[%s816_s16 + $0x200] sm:$0xff] %v307_v2  ;;  %396 = vst [vmem:[%s816_s16 + $0x208] sm:$0xff] %v308_v3  ;;  %v313_v14 = vadd.f32 1.0, %v225_v11  ;;  %v314_v15 = vadd.f32 1.0, %v226_v12  ;;  %v227_v16 = vld [vmem:[%s801_s3 + $0x240] sm:$0xff]  ;;  %v228_v17 = vld [vmem:[%s801_s3 + $0x248] sm:$0xff] }
  0x69   : > { %v229_v18 = vld [vmem:[%s801_s3 + $0x250] sm:$0xff]  ;;  %397 = vst [vmem:[%s816_s16 + $0x210] sm:$0xff] %v309_v7  ;;  %398 = vst [vmem:[%s816_s16 + $0x218] sm:$0xff] %v310_v8  ;;  %v315_v19 = vadd.f32 1.0, %v227_v16  ;;  %v316_v20 = vadd.f32 1.0, %v228_v17  ;;  %v230_v22 = vld [vmem:[%s801_s3 + $0x258] sm:$0xff] }
  0x6a   : > { %399 = vst [vmem:[%s816_s16 + $0x220] sm:$0xff] %v311_v9  ;;  %v317_v21 = vadd.f32 1.0, %v229_v18  ;;  %v231_v23 = vld [vmem:[%s801_s3 + $0x260] sm:$0xff]  ;;  %v232_v24 = vld [vmem:[%s801_s3 + $0x268] sm:$0xff]  ;;  %400 = vst [vmem:[%s816_s16 + $0x228] sm:$0xff] %v312_v13  ;;  %v318_v25 = vadd.f32 1.0, %v230_v22 }
  0x6b   : > { %401 = vst [vmem:[%s816_s16 + $0x230] sm:$0xff] %v313_v14  ;;  %402 = vst [vmem:[%s816_s16 + $0x238] sm:$0xff] %v314_v15  ;;  %v319_v26 = vadd.f32 1.0, %v231_v23  ;;  %v320_v27 = vadd.f32 1.0, %v232_v24  ;;  %v233_v28 = vld [vmem:[%s801_s3 + $0x270] sm:$0xff]  ;;  %v234_v29 = vld [vmem:[%s801_s3 + $0x278] sm:$0xff] }
  0x6c   : > { %v235_v30 = vld [vmem:[%s801_s3 + $0x280] sm:$0xff]  ;;  %403 = vst [vmem:[%s816_s16 + $0x240] sm:$0xff] %v315_v19  ;;  %404 = vst [vmem:[%s816_s16 + $0x248] sm:$0xff] %v316_v20  ;;  %v321_v31 = vadd.f32 1.0, %v233_v28  ;;  %v322_v32 = vadd.f32 1.0, %v234_v29  ;;  %v236_v34 = vld [vmem:[%s801_s3 + $0x288] sm:$0xff] }
  0x6d   : > { %405 = vst [vmem:[%s816_s16 + $0x250] sm:$0xff] %v317_v21  ;;  %v323_v33 = vadd.f32 1.0, %v235_v30  ;;  %v237_v35 = vld [vmem:[%s801_s3 + $0x290] sm:$0xff]  ;;  %v238_v36 = vld [vmem:[%s801_s3 + $0x298] sm:$0xff]  ;;  %406 = vst [vmem:[%s816_s16 + $0x258] sm:$0xff] %v318_v25  ;;  %v324_v37 = vadd.f32 1.0, %v236_v34 }
  0x6e   : > { %407 = vst [vmem:[%s816_s16 + $0x260] sm:$0xff] %v319_v26  ;;  %408 = vst [vmem:[%s816_s16 + $0x268] sm:$0xff] %v320_v27  ;;  %v325_v38 = vadd.f32 1.0, %v237_v35  ;;  %v326_v39 = vadd.f32 1.0, %v238_v36  ;;  %v239_v40 = vld [vmem:[%s801_s3 + $0x2a0] sm:$0xff]  ;;  %v240_v41 = vld [vmem:[%s801_s3 + $0x2a8] sm:$0xff] }
  0x6f   : > { %v241_v42 = vld [vmem:[%s801_s3 + $0x2b0] sm:$0xff]  ;;  %409 = vst [vmem:[%s816_s16 + $0x270] sm:$0xff] %v321_v31  ;;  %410 = vst [vmem:[%s816_s16 + $0x278] sm:$0xff] %v322_v32  ;;  %v327_v43 = vadd.f32 1.0, %v239_v40  ;;  %v328_v44 = vadd.f32 1.0, %v240_v41  ;;  %v242_v46 = vld [vmem:[%s801_s3 + $0x2b8] sm:$0xff] }
  0x70   : > { %411 = vst [vmem:[%s816_s16 + $0x280] sm:$0xff] %v323_v33  ;;  %v329_v45 = vadd.f32 1.0, %v241_v42  ;;  %412 = vst [vmem:[%s816_s16 + $0x288] sm:$0xff] %v324_v37  ;;  %v330_v47 = vadd.f32 1.0, %v242_v46  ;;  %426 = sbr.rel (!%p743_p9) target bundleno = 147 (0x93), region = 32  ;;  %s428_s28 = ssub.s32 (%p743_p9), 42, %s427_s25 }
  0x71   : > { %413 = vst [vmem:[%s816_s16 + $0x290] sm:$0xff] %v325_v38  ;;  %414 = vst [vmem:[%s816_s16 + $0x298] sm:$0xff] %v326_v39  ;;  %p429_p6 = scmp.lt.s32.totalorder (%p743_p9), %s428_s28, 11 }
  0x72   : > { %415 = vst [vmem:[%s816_s16 + $0x2a0] sm:$0xff] %v327_v43  ;;  %416 = vst [vmem:[%s816_s16 + $0x2a8] sm:$0xff] %v328_v44 }
  0x73   : > { %417 = vst [vmem:[%s816_s16 + $0x2b0] sm:$0xff] %v329_v45  ;;  %418 = vst [vmem:[%s816_s16 + $0x2b8] sm:$0xff] %v330_v47 }
  0x77   : > { %s1060_s28 = smov (!%p429_p6, %s428_s28), 11 }
  0x78   : > { %s989_s2 = sshll.u32 %s1060_s28, 10 }
  0x79   : > { %s434_s4 = ssub.s32 11264, %s989_s2 }
  0x7a   : > { %435 = vsyncadd %s420_s23, %s434_s4  ;;  %p527_p10 = scmp.ne.s32.totalorder %s989_s2, 0  ;;  %s541_s17 = smul.u32 11264, %s720_s10 }
  0x7b   : > { %s441_s5 = sshll.u32 %s816_s16, 4  ;;  %s686_s20 = smov [#allocation5]   ;;  %s1002_s5 = int_to_ptr.vmem [resolvable:$true] %s441_s5 }
  0x7c   : > { %s1000_s14 = scalar_lea.hbm %s1048_s1, %s541_s17  ;;  %s615_s19 = scalar_lea.vmem %s1002_s5, %s989_s2 }
  0x7d   : > { %p616_p9 = scmp.ne.s32.totalorder %s1002_s5, %s615_s19  ;;  %s619_s21 = sshll.u32 %s686_s20, 4  ;;  %s620_s21 = int_to_ptr.vmem [resolvable:$false] %s619_s21 }
  0x7e   : > { %s621_s10 = scalar_lea.vmem %s620_s21, 22528  ;;  %p622_p12 = scmp.lt.s32.totalorder %s1002_s5, %s620_s21 }
  0x7f   : > { %p617_p13 = pnand %p616_p9, %p527_p10  ;;  %p623_p0 = scmp.lt.s32.totalorder %s621_s10, %s615_s19 }
  0x81   : > { %p618_p11 = pneg %p617_p13  ;;  %p624_p1 = por %p623_p0, %p622_p12 }
  0x83   : > { %p625_p3 = pnand %p624_p1, %p618_p11 }
  0x85   : > { %628 = shalt.err (!%p625_p3)
}
  0x86   : > { %s629_s22 = scalar_lea.hbm %s1000_s14, %s989_s2  ;;  %s633_s29 = scalar_lea.hbm %s1048_s1, 43008 }
  0x87   : > { %p630_p4 = scmp.ne.s32.totalorder %s1000_s14, %s629_s22  ;;  %p634_p7 = scmp.lt.u32.totalorder %s1000_s14, %s1048_s1 }
  0x88   : > { %p635_p8 = scmp.lt.u32.totalorder %s633_s29, %s629_s22  ;;  %p637_p9 = scmp.lt.u32.totalorder %s629_s22, %s1000_s14 }
  0x89   : > { %p631_p5 = pnand %p630_p4, %p527_p10 }
  0x8a   : > { %p636_p6 = por %p635_p8, %p634_p7 }
  0x8b   : > { %p632_p2 = pneg %p631_p5 }
  0x8c   : > { %p638_p13 = por %p637_p9, %p636_p6 }
  0x8e   : > { %p639_p11 = pnand %p638_p13, %p632_p2 }
  0x90   : > { %642 = shalt.err (!%p639_p11)
}
  0x91   : > { %s687_s16 = smov 1024   ;;  %s688_s25 = smov 64  }
  0x92   : > { %447 = dma.vmem_to_hbm [thread:$0]  (%p527_p10), %s1002_s5, %s989_s2, %s1000_s14, %s420_s23, %s687_s16, %s687_s16, %s688_s25  }
  0x93 PF: > { %p550_p12 = scmp.ge.s32.totalorder %s681_s9, 2  ;;  %s456_s28 = sand.u32 1, %s669_s6  }
  0x94   : > { %p1052_p0 = scmp.ne.s32.totalorder %s1051_s18, 0  ;;  %s457_s4 = scalar_lea.sflag [#allocation4], %s456_s28 }
  0x96   : > { %p547_p1 = pnand %p550_p12, %p1052_p0 }
  0x98   : > { %664 = dma.done.wait (!%p547_p1), %s457_s4, 11264  }
  0x99   : > { %666 = vsyncadd (!%p547_p1), %s457_s4, 4294956032  ;;  %p14_p3 = scmp.ge.s32.totalorder %s724_s12, 6   ;;  %s1053_s6 = smov %s673_s7 }
  0x9a   : > { %s1054_s7 = smov %s677_s8  ;;  %s1055_s8 = smov %s736_s15 }
  0x9b   : > { %s1056_s9 = smov %s724_s12  ;;  %16 = sbr.rel (!%p14_p3) target bundleno = 5 (0x5), region = 69 }
  0xa2   :  { %462 = vsyncpa [#allocation3], 1 }
  0xa3   :  { %464 = vsyncpa [#allocation3 + $0x1], 1 }
  0xa4   :  { %465 = vsyncpa [#allocation4], 1 }
  0xa5   :  { %467 = vsyncpa [#allocation4 + $0x1], 1 }

</bundles_post_ra>
